<compile_context>
chip_gen: v7x
topology: tpu7x:2x2x1
jax: 0.10.0
libtpu: 0.0.40
codegen_flags: <defaults>
</compile_context>

<pallas_src>
import jax
import jax.numpy as jnp
from jax.experimental import pallas as pl
from jax.experimental.pallas import tpu as pltpu


def _fused_pool_matrix(H, W, stride, dtype):
    """(H*W, Ho*Wo) 0/1 matrix implementing AvgPool2d(stride)'s window summation.

    Column (ho*Wo + wo) selects the stride x stride input window; ragged H/W
    remainders never match any column, matching AvgPool2d's floor semantics.
    """
    Ho, Wo = H // stride, W // stride
    hw = jnp.arange(H * W, dtype=jnp.int32)
    h, w = hw // W, hw % W
    q = jnp.arange(Ho * Wo, dtype=jnp.int32)
    ho, wo = q // Wo, q % Wo
    sel = ((h[:, None] // stride) == ho[None, :]) & (
        (w[:, None] // stride) == wo[None, :])
    return sel.astype(dtype)


def _pick_block_c(C, HW, HoWo, expand_ratio, itemsize):
    """Channel block: ~1 MiB of input+output per grid step, multiple of 8 sublanes."""
    per_chan = (HW + expand_ratio * HoWo) * itemsize
    bc = (1 << 20) // max(per_chan, 1)
    if bc >= C:
        return C
    bc = max(8, (bc // 8) * 8)
    return min(bc, C)


def _make_kernel(expand_ratio, inv_scale, cast_to_f32):
    def kernel(x_ref, p_ref, o_ref):
        # x_ref: (1, bc, H*W)        input channel block, spatially flattened
        # p_ref: (H*W, Ho*Wo)        constant 0/1 pooling matrix
        # o_ref: (1, r, bc, Ho*Wo)   [0] = pooled block, [1:] = zero expansion
        x = x_ref[0]
        if cast_to_f32:
            x = x.astype(jnp.float32)
        # Single fused MXU matmul: (bc, H*W) @ (H*W, Ho*Wo) -> (bc, Ho*Wo), f32 acc.
        y = jnp.dot(x, p_ref[...], preferred_element_type=jnp.float32)
        y = y * inv_scale                                   # single scale at finalize
        o_ref[0, 0] = y.astype(o_ref.dtype)
        if expand_ratio > 1:
            r, bc, howo = o_ref.shape[1], o_ref.shape[2], o_ref.shape[3]
            o_ref[0, 1:] = jnp.zeros((r - 1, bc, howo), o_ref.dtype)

    return kernel


def downsample(x, stride, expand_ratio):
    """x: (N, C, H, W) -> (N, C*expand_ratio, H//stride, W//stride)."""
    N, C, H, W = x.shape
    Ho, Wo = H // stride, W // stride
    HW, HoWo = H * W, Ho * Wo
    r = expand_ratio
    itemsize = jnp.dtype(x.dtype).itemsize

    # bf16 inputs go to the MXU as bf16 (exact: P is 0/1, accumulation is f32);
    # anything else pools in f32 so precision never drops below the reference.
    if x.dtype == jnp.bfloat16:
        p_dtype, cast_to_f32 = jnp.bfloat16, False
    elif x.dtype == jnp.float32:
        p_dtype, cast_to_f32 = jnp.float32, False
    else:
        p_dtype, cast_to_f32 = jnp.float32, True

    p = _fused_pool_matrix(H, W, stride, p_dtype)           # (HW, HoWo)
    p_itemsize = jnp.dtype(p_dtype).itemsize

    block_c = _pick_block_c(C, HW, HoWo, r, itemsize)
    grid = (N, pl.cdiv(C, block_c))

    x_flat = x.reshape(N, C, HW)                            # free: contiguous merge

    kernel = _make_kernel(r, 1.0 / float(stride * stride), cast_to_f32)

    # Explicit VMEM budget: double-buffered x/out blocks, P (constant index map ->
    # fetched once, but budget 2 buffers conservatively), f32 accumulator, headroom.
    # TODO(synk): for very large spatial inputs (P = H*W x Ho*Wo beyond a few MiB,
    # i.e. >~64x64 images) block the matmul over K = H*W instead of holding all of P.
    x_blk = block_c * HW * itemsize
    o_blk = r * block_c * HoWo * itemsize
    p_blk = HW * HoWo * p_itemsize
    vmem_needed = 2 * (x_blk + o_blk) + 2 * p_blk + block_c * HoWo * 4 + (1 << 20)
    vmem_limit = int(min(max(vmem_needed, 16 << 20), 64 << 20))

    flops = 2 * N * C * HW * HoWo                           # one fused matmul
    bytes_accessed = (N * C * HW * itemsize                 # input read
                      + p_blk                               # pooling matrix (once)
                      + N * C * r * HoWo * itemsize)        # output write

    out5 = pl.pallas_call(
        kernel,
        out_shape=jax.ShapeDtypeStruct((N, r, C, HoWo), x.dtype),
        grid=grid,
        in_specs=[
            pl.BlockSpec((1, block_c, HW), lambda n, j: (n, j, 0)),
            pl.BlockSpec((HW, HoWo), lambda n, j: (0, 0)),
        ],
        out_specs=pl.BlockSpec((1, r, block_c, HoWo), lambda n, j: (n, 0, j, 0)),
        compiler_params=pltpu.CompilerParams(
            dimension_semantics=("parallel", "parallel"),
            vmem_limit_bytes=vmem_limit,
        ),
        cost_estimate=pl.CostEstimate(
            flops=flops, transcendentals=0, bytes_accessed=bytes_accessed),
    )(x_flat, p)

    # (N, r, C, Ho*Wo) -> (N, r*C, Ho, Wo): exactly torch.cat([y, 0, ...], dim=1).
    return out5.reshape(N, r * C, Ho, Wo)


if __name__ == "__main__":
    key = jax.random.PRNGKey(0)
    N, C, H, W = 2, 4, 16, 16
    stride, expand_ratio = 2, 2          # nIn=4, nOut=8

    x = jax.random.normal(key, (N, C, H, W), dtype=jnp.float32)

    out = downsample(x, stride, expand_ratio)
    out = jax.block_until_ready(out)

    # Pure-JAX reference: AvgPool2d(stride) + concat with zero channels.
    Ho, Wo = H // stride, W // stride
    xr = x[:, :, :Ho * stride, :Wo * stride].reshape(N, C, Ho, stride, Wo, stride)
    pooled = xr.mean(axis=(3, 5))
    ref = jnp.concatenate(
        [pooled] + [jnp.zeros_like(pooled)] * (expand_ratio - 1), axis=1)

    assert out.shape == (N, C * expand_ratio, Ho, Wo)
    assert jnp.allclose(out, ref, atol=1e-5, rtol=1e-5)

    print("KERNEL_OK")
</pallas_src>

<mosaic_0001>
module attributes {stable_mosaic.version = 11 : i64} {
  func.func @kernel(%arg0: i32, %arg1: i32, %arg2: memref<1x4x256xf32, #tpu.memory_space<vmem>>, %arg3: memref<256x64xf32, #tpu.memory_space<vmem>>, %arg4: memref<1x2x4x64xf32, #tpu.memory_space<vmem>>) attributes {dimension_semantics = [#tpu.dimension_semantics<parallel>, #tpu.dimension_semantics<parallel>], iteration_bounds = array<i64: 2, 1>, scalar_prefetch = 0 : i64, scratch_operands = 0 : i64, tpu.core_type = #tpu.core_type<tc>, window_params = [{transform_indices = @transform_0, window_bounds = array<i64: 1, 4, 256>}, {pipeline_mode = #tpu.pipeline_mode<synchronous>, transform_indices = @transform_1, window_bounds = array<i64: 256, 64>}, {transform_indices = @transform_2, window_bounds = array<i64: 1, 2, 4, 64>}]} {
    %c0 = arith.constant 0 : index
    %c0_0 = arith.constant 0 : index
    %c0_1 = arith.constant 0 : index
    %0 = vector.load %arg2[%c0, %c0_0, %c0_1] : memref<1x4x256xf32, #tpu.memory_space<vmem>>, vector<1x4x256xf32>
    %1 = vector.shape_cast %0 : vector<1x4x256xf32> to vector<4x256xf32>
    %c0_2 = arith.constant 0 : index
    %c0_3 = arith.constant 0 : index
    %2 = vector.load %arg3[%c0_2, %c0_3] : memref<256x64xf32, #tpu.memory_space<vmem>>, vector<256x64xf32>
    %cst = arith.constant dense<0.000000e+00> : vector<4x64xf32>
    %3 = tpu.matmul %1, %2, %cst {dimension_numbers = #tpu.dot_dimension_numbers<[1], [0], [0], [1], [0, 0, 1, 1], [], []>} : vector<4x256xf32>, vector<256x64xf32>, vector<4x64xf32> -> vector<4x64xf32>
    %cst_4 = arith.constant 2.500000e-01 : f32
    %4 = vector.broadcast %cst_4 : f32 to vector<4x64xf32>
    %5 = arith.mulf %3, %4 : vector<4x64xf32>
    %c0_5 = arith.constant 0 : index
    %c0_6 = arith.constant 0 : index
    %c0_7 = arith.constant 0 : index
    %c0_8 = arith.constant 0 : index
    %6 = vector.load %arg4[%c0_5, %c0_6, %c0_7, %c0_8] : memref<1x2x4x64xf32, #tpu.memory_space<vmem>>, vector<1x1x4x64xf32>
    %7 = vector.shape_cast %6 : vector<1x1x4x64xf32> to vector<4x64xf32>
    %8 = vector.shape_cast %5 : vector<4x64xf32> to vector<1x1x4x64xf32>
    tpu.vector_store %arg4[%c0_5, %c0_6, %c0_7, %c0_8], %8 {strides = array<i32>} : memref<1x2x4x64xf32, #tpu.memory_space<vmem>>, vector<1x1x4x64xf32>,
    %cst_9 = arith.constant 0.000000e+00 : f32
    %9 = vector.broadcast %cst_9 : f32 to vector<1x4x64xf32>
    %c0_10 = arith.constant 0 : index
    %c1 = arith.constant 1 : index
    %c0_11 = arith.constant 0 : index
    %c0_12 = arith.constant 0 : index
    %10 = vector.load %arg4[%c0_10, %c1, %c0_11, %c0_12] : memref<1x2x4x64xf32, #tpu.memory_space<vmem>>, vector<1x1x4x64xf32>
    %11 = vector.shape_cast %10 : vector<1x1x4x64xf32> to vector<1x4x64xf32>
    %12 = vector.shape_cast %9 : vector<1x4x64xf32> to vector<1x1x4x64xf32>
    tpu.vector_store %arg4[%c0_10, %c1, %c0_11, %c0_12], %12 {strides = array<i32>} : memref<1x2x4x64xf32, #tpu.memory_space<vmem>>, vector<1x1x4x64xf32>,
    return
  }
  func.func @transform_0(%arg0: i32, %arg1: i32) -> (i32, i32, i32) {
    %c0_i32 = arith.constant 0 : i32
    %c0_i32_0 = arith.constant 0 : i32
    return %arg0, %arg1, %c0_i32 : i32, i32, i32
  }
  func.func @transform_1(%arg0: i32, %arg1: i32) -> (i32, i32) {
    %c0_i32 = arith.constant 0 : i32
    %c0_i32_0 = arith.constant 0 : i32
    %c0_i32_1 = arith.constant 0 : i32
    return %c0_i32, %c0_i32_0 : i32, i32
  }
  func.func @transform_2(%arg0: i32, %arg1: i32) -> (i32, i32, i32, i32) {
    %c0_i32 = arith.constant 0 : i32
    %c0_i32_0 = arith.constant 0 : i32
    %c0_i32_1 = arith.constant 0 : i32
    return %arg0, %c0_i32, %arg1, %c0_i32_0 : i32, i32, i32, i32
  }
}

</mosaic_0001>

<bundles_post_ra>
// kernel: tpu_custom_call.1
= control target key start
LH: loop header
LB: loop body
LE: loop exit
PB: predicated region body
PF: predicated region fallthrough
CT: control target
= control target key end

     0   :  { %7 = vsyncpa [#allocation3], 0  ;;  %s829_s0 = inlined_call_operand.vmem [shape: f32[2,4,256], index: 0, kind: input, shape index: {}]   ;;  %s830_s1 = inlined_call_operand.vmem [shape: f32[256,64], index: 1, kind: input, shape index: {}]   ;;  %s831_s2 = inlined_call_operand.hbm [shape: f32[2,2,4,64], index: 2, kind: output, shape index: {}]  }
   0x1   :  { %9 = vsyncpa [#allocation3 + $0x1], 0  ;;  %s618_s9 = smov 0   ;;  %s620_s10 = smov 0  }
   0x2   :  { %s622_s11 = smov 0   ;;  %s624_s12 = smov 0  }
   0x3   :  { %s626_s13 = smov 0   ;;  %s628_s14 = smov 0  }
   0x4 LB: > { %s377_s15 = sadd.s32 4294967295, %s597_s14   ;;  %s378_s16 = sadd.s32 4294967294, %s597_s14   ;;  %s597_s14 = sphi %s628_s14, %s15_s14   ;;  %s593_s13 = sphi %s626_s13, %s838_s13   ;;  %s589_s12 = sphi %s624_s12, %s837_s12   ;;  %s585_s11 = sphi %s622_s11, %s836_s11   ;;  %s581_s10 = sphi %s620_s10, %s835_s10   ;;  %s577_s9 = sphi %s618_s9, %s834_s9  }
   0x5   : > { %s27_s17 = sadd.s32 1, %s593_s13  ;;  %s85_s18 = sadd.s32 1, %s585_s11 }
   0x6   : > { %p29_p0 = scmp.ge.s32.totalorder %s27_s17, 2  ;;  %p95_p1 = scmp.ne.s32.totalorder %s585_s11, %s581_s10 }
   0x7   : > { %p96_p2 = scmp.eq.s32.totalorder %s377_s15, 1  ;;  %p101_p3 = scmp.ne.s32.totalorder %s581_s10, %s577_s9 }
   0x8   : > { %s840_s17 = smov (%p29_p0, %s27_s17), 0  ;;  %p102_p5 = scmp.eq.s32.totalorder %s378_s16, 1 }
   0x9   : > { %p658_p4 = por %p96_p2, %p95_p1  ;;  %s80_s20 = ssub.s32 %s593_s13, %s840_s17 }
   0xa   : > { %p381_p6 = scmp.ge.s32.totalorder %s597_s14, 1  ;;  %p83_p7 = scmp.eq.s32.totalorder %s80_s20, 0 }
   0xb   : > { %p665_p8 = por %p102_p5, %p101_p3  ;;  %p135_p9 = scmp.lt.s32.totalorder %s597_s14, 3 }
   0xc   : > { %s671_s22 = scalar_select %p83_p7, %s585_s11, %s85_s18  }
   0xd   : > { %p136_p10 = pnand %p381_p6, %p135_p9 }
   0xe   : > { %v187_v0 = vld [vmem:[%s830_s1 + $0x80] sm:$0xff] (!%p136_p10)  ;;  %v188_v1 = vld [vmem:[%s830_s1 + $0x88] sm:$0xff] (!%p136_p10)  ;;  %p161_p11 = scmp.lt.s32.totalorder (!%p136_p10), %s589_s12, 1  ;;  %v189_v5 = vld [vmem:[%s830_s1 + $0x90] sm:$0xff] (!%p136_p10)  ;;  %s158_s16 = sand.u32 (!%p136_p10), 1, %s581_s10   ;;  %vm277_vm0 = vcmask (!%p136_p10), 519168  }
   0xf   : > { %139 = sbr.rel (%p136_p10) target bundleno = 281 (0x119), region = 28  ;;  %v171_v2 = vld [vmem:[%s830_s1] sm:$0xff] (!%p136_p10)  ;;  %v428_v3 = vpack.c.bf16 (!%p136_p10), %v188_v1, %v187_v0  ;;  %v172_v4 = vld [vmem:[%s830_s1 + $0x8] sm:$0xff] (!%p136_p10)  ;;  %v190_v6 = vld [vmem:[%s830_s1 + $0x98] sm:$0xff] (!%p136_p10)  ;;  %s382_s18 = sshll.u32 (!%p136_p10), %s158_s16, 3  ;;  %v599_v50 = vmov (!%p136_p10), 0.0  }
  0x10   : > { %v430_v7 = vpack.c.bf16 (!%p136_p10), %v172_v4, %v171_v2  ;;  %v432_v8 = vpack.c.bf16 (!%p136_p10), %v190_v6, %v189_v5  ;;  %v173_v9 = vld [vmem:[%s830_s1 + $0x10] sm:$0xff] (!%p136_p10)  ;;  %v174_v10 = vld [vmem:[%s830_s1 + $0x18] sm:$0xff] (!%p136_p10)  ;;  %v191_v11 = vld [vmem:[%s830_s1 + $0xa0] sm:$0xff] (!%p136_p10)  ;;  %s160_s20 = scalar_lea.vmem (!%p136_p10), [#allocation2], %s382_s18  ;;  %s392_s24 = sshll.u32 (!%p136_p10), %s589_s12, 7 }
  0x11   : > { %429 = vmatprep.subr.bf16.mxu0 (!%p136_p10), %v428_v3  ;;  %v192_v12 = vld [vmem:[%s830_s1 + $0xa8] sm:$0xff] (!%p136_p10)  ;;  %v434_v13 = vpack.c.bf16 (!%p136_p10), %v174_v10, %v173_v9  ;;  %v175_v15 = vld [vmem:[%s830_s1 + $0x20] sm:$0xff] (!%p136_p10)  ;;  %v193_v17 = vld [vmem:[%s830_s1 + $0xb0] sm:$0xff] (!%p136_p10)  ;;  %385 = vst.msk [vmem:[%s160_s20 + $0x4] sm:$0xf] (!%p136_p10), %vm277_vm0, %v599_v50  ;;  %s781_s28 = scalar_lea.hbm (!%p136_p10), %s831_s2, %s392_s24 }
  0x12   : > { %431 = vmatpush3.bf16.msra.mxu0 (!%p136_p10), %v430_v7  ;;  %v436_v14 = vpack.c.bf16 (!%p136_p10), %v192_v12, %v191_v11  ;;  %v176_v16 = vld [vmem:[%s830_s1 + $0x28] sm:$0xff] (!%p136_p10)  ;;  %v194_v18 = vld [vmem:[%s830_s1 + $0xb8] sm:$0xff] (!%p136_p10)  ;;  %v177_v21 = vld [vmem:[%s830_s1 + $0x30] sm:$0xff] (!%p136_p10) }
  0x13   : > { %433 = vmatprep.subr.bf16.mxu0 (!%p136_p10), %v432_v8  ;;  %v438_v19 = vpack.c.bf16 (!%p136_p10), %v176_v16, %v175_v15  ;;  %v440_v20 = vpack.c.bf16 (!%p136_p10), %v194_v18, %v193_v17  ;;  %v178_v22 = vld [vmem:[%s830_s1 + $0x38] sm:$0xff] (!%p136_p10)  ;;  %v195_v23 = vld [vmem:[%s830_s1 + $0xc0] sm:$0xff] (!%p136_p10)  ;;  %v196_v24 = vld [vmem:[%s830_s1 + $0xc8] sm:$0xff] (!%p136_p10) }
  0x14   : > { %v442_v27 = vpack.c.bf16 (!%p136_p10), %v178_v22, %v177_v21  ;;  %v444_v28 = vpack.c.bf16 (!%p136_p10), %v196_v24, %v195_v23  ;;  %v179_v29 = vld [vmem:[%s830_s1 + $0x40] sm:$0xff] (!%p136_p10)  ;;  %v180_v30 = vld [vmem:[%s830_s1 + $0x48] sm:$0xff] (!%p136_p10)  ;;  %v197_v31 = vld [vmem:[%s830_s1 + $0xd0] sm:$0xff] (!%p136_p10) }
  0x15   : > { %v198_v32 = vld [vmem:[%s830_s1 + $0xd8] sm:$0xff] (!%p136_p10)  ;;  %v446_v33 = vpack.c.bf16 (!%p136_p10), %v180_v30, %v179_v29  ;;  %v181_v35 = vld [vmem:[%s830_s1 + $0x50] sm:$0xff] (!%p136_p10)  ;;  %v199_v37 = vld [vmem:[%s830_s1 + $0xe0] sm:$0xff] (!%p136_p10) }
  0x16   : > { %s162_s23 = scalar_select %p161_p11, %s589_s12, 1  ;;  %435 = vmatpush3.bf16.msra.mxu0 %v434_v13  ;;  %v448_v34 = vpack.c.bf16 %v198_v32, %v197_v31  ;;  %v182_v36 = vld [vmem:[%s830_s1 + $0x58] sm:$0xff]  ;;  %v200_v38 = vld [vmem:[%s830_s1 + $0xe8] sm:$0xff]  ;;  %v183_v41 = vld [vmem:[%s830_s1 + $0x60] sm:$0xff] }
  0x17   : > { %437 = vmatprep.subr.bf16.mxu0 %v436_v14  ;;  %v450_v39 = vpack.c.bf16 %v182_v36, %v181_v35  ;;  %v452_v40 = vpack.c.bf16 %v200_v38, %v199_v37  ;;  %v184_v42 = vld [vmem:[%s830_s1 + $0x68] sm:$0xff]  ;;  %v201_v43 = vld [vmem:[%s830_s1 + $0xf0] sm:$0xff]  ;;  %v202_v44 = vld [vmem:[%s830_s1 + $0xf8] sm:$0xff]  ;;  %s600_s12 = smov [#allocation2]  }
  0x18   : > { %s391_s26 = sshll.u32 %s162_s23, 3  ;;  %v454_v45 = vpack.c.bf16 %v184_v42, %v183_v41  ;;  %v456_v46 = vpack.c.bf16 %v202_v44, %v201_v43  ;;  %v185_v47 = vld [vmem:[%s830_s1 + $0x70] sm:$0xff]  ;;  %v186_v48 = vld [vmem:[%s830_s1 + $0x78] sm:$0xff]  ;;  %s296_s23 = sshll.u32 %s160_s20, 4  ;;  %s776_s23 = int_to_ptr.vmem [resolvable:$true] %s296_s23 }
  0x19   : > { %s169_s15 = scalar_lea.vmem %s829_s0, %s391_s26  ;;  %v458_v49 = vpack.c.bf16 %v186_v48, %v185_v47  ;;  %s783_s26 = scalar_lea.sflag [#allocation3], %s158_s16 }
  0x1a   : > { %v170_v25 = vld [vmem:[%s169_s15] sm:$0xff]  ;;  %439 = vmatpush3.bf16.msra.mxu0 %v438_v19  ;;  %s519_s29 = scalar_lea.vmem %s776_s23, 128  ;;  %s523_s30 = sshll.u32 %s600_s12, 4  ;;  %s524_s30 = int_to_ptr.vmem [resolvable:$false] %s523_s30 }
  0x1b   : > { %v204_v26 = vcombine.high %v170_v25, %v170_v25  ;;  %441 = vmatprep.subr.bf16.mxu0 %v440_v20  ;;  %p520_p12 = scmp.ne.s32.totalorder %s776_s23, %s519_s29  ;;  %s525_s3 = scalar_lea.vmem %s524_s30, 256 }
  0x1c   : > { %p526_p1 = scmp.lt.s32.totalorder %s776_s23, %s524_s30  ;;  %p527_p2 = scmp.lt.s32.totalorder %s525_s3, %s519_s29 }
  0x1d   : > { %270 = vmatprep.mubr.f32.mxu0 %v204_v26  ;;  %p521_p13 = pnand %p520_p12, %p658_p4 }
  0x1e   : > { %443 = vmatpush3.bf16.msra.mxu0 %v442_v27  ;;  %p528_p3 = por %p527_p2, %p526_p1 }
  0x1f   : > { %445 = vmatprep.subr.bf16.mxu0 %v444_v28  ;;  %p522_p0 = pneg %p521_p13 }
  0x21   : > { %p529_p5 = pnand %p528_p3, %p522_p0 }
  0x22   : > { %447 = vmatpush3.bf16.msra.mxu0 %v446_v33 }
  0x23   : > { %449 = vmatprep.subr.bf16.mxu0 %v448_v34 }
  0x26   : > { %451 = vmatpush3.bf16.msra.mxu0 %v450_v39 }
  0x27   : > { %453 = vmatprep.subr.bf16.mxu0 %v452_v40 }
  0x2a   : > { %455 = vmatpush3.bf16.msra.mxu0 %v454_v45 }
  0x2b   : > { %457 = vmatprep.subr.bf16.mxu0 %v456_v46 }
  0x2e   : > { %459 = vmatpush3.bf16.msra.mxu0 %v458_v49 }
  0x31   : > { %271 = vmatmul.mubr.f32.vlgmr.msra.gmra.mrb[0].mxu0 %v170_v25 }
 0x104   : > { %v425_v51 = vpop.f32.mrb[0].mxu0 }
 0x105   : > { %v426_v52 = vpop.f32.mrb[1].mxu0 }
 0x106   : > { %v427_v53 = vadd.f32 %v426_v52, %v425_v51 }
 0x108   : > { %v276_v54 = vmul.f32 0.25, %v427_v53 }
 0x10a   : > { %278 = vst.msk [vmem:[%s160_s20] sm:$0xf] %vm277_vm0, %v276_v54 }
 0x10b   : > { %532 = shalt.err (!%p529_p5)
}
 0x10c   : > { %s533_s4 = scalar_lea.hbm %s781_s28, 128  ;;  %s537_s7 = scalar_lea.hbm %s831_s2, 256 }
 0x10d   : > { %p534_p6 = scmp.ne.s32.totalorder %s781_s28, %s533_s4  ;;  %p538_p10 = scmp.lt.u32.totalorder %s781_s28, %s831_s2 }
 0x10e   : > { %p539_p11 = scmp.lt.u32.totalorder %s537_s7, %s533_s4  ;;  %p541_p13 = scmp.lt.u32.totalorder %s533_s4, %s781_s28 }
 0x10f   : > { %p535_p7 = pnand %p534_p6, %p658_p4 }
 0x110   : > { %p540_p12 = por %p539_p11, %p538_p10 }
 0x111   : > { %p536_p9 = pneg %p535_p7 }
 0x112   : > { %p542_p0 = por %p541_p13, %p540_p12 }
 0x114   : > { %p543_p1 = pnand %p542_p0, %p536_p9 }
 0x116   : > { %546 = shalt.err (!%p543_p1)
}
 0x117   : > { %s601_s16 = smov 64   ;;  %s602_s18 = smov 4  }
 0x118   : > { %460 = dma.vmem_to_hbm [thread:$0]  (%p658_p4), %s776_s23, 128, %s781_s28, %s783_s26, %s601_s16, %s601_s16, %s602_s18  }
 0x119 PF: > { %p466_p2 = scmp.ge.s32.totalorder %s597_s14, 2  ;;  %s311_s20 = sand.u32 1, %s577_s9  }
 0x11a   : > { %s312_s24 = scalar_lea.sflag [#allocation3], %s311_s20 }
 0x11b   : > { %p463_p3 = pnand %p466_p2, %p665_p8 }
 0x11d   : > { %572 = dma.done.wait (!%p463_p3), %s312_s24, 128  }
 0x11e   : > { %574 = vsyncadd (!%p463_p3), %s312_s24, 4294967168  ;;  %s15_s14 = sadd.s32 1, %s597_s14   ;;  %s834_s9 = smov %s581_s10 }
 0x11f   : > { %p12_p5 = scmp.ge.s32.totalorder %s15_s14, 4   ;;  %s835_s10 = smov %s585_s11 }
 0x120   : > { %s836_s11 = smov %s671_s22  ;;  %s837_s12 = smov %s593_s13 }
 0x121   : > { %s838_s13 = smov %s840_s17  ;;  %14 = sbr.rel (!%p12_p5) target bundleno = 4 (0x4), region = 64 }
 0x128   :  { %317 = vsyncpa [#allocation3], 1 }
 0x129   :  { %319 = vsyncpa [#allocation3 + $0x1], 1 }

</bundles_post_ra>
